<compile_context>
chip_gen: v7x
topology: tpu7x:2x2x1
jax: 0.10.0
libtpu: 0.0.40
codegen_flags: <defaults>
</compile_context>

<pallas_src>
import jax
import jax.numpy as jnp
from jax import lax
from jax.experimental import pallas as pl
from jax.experimental.pallas import tpu as pltpu

EPS = 1e-5
VMEM_LIMIT = 32 * 1024 * 1024  # safe on all generations; tiles sized to fit


def _round_up(v, m):
    return (v + m - 1) // m * m


def _cdiv(a, b):
    return -(-a // b)


# --------------------------------------------------------------------------
# Kernels
# --------------------------------------------------------------------------
def _layer1(x, w1):
    # Cin == 3: three VPU broadcast multiply-adds.  A K=3 MXU matmul would
    # waste >97% of the systolic array and pay full fill/drain latency.
    return (x[:, 0:1] * w1[0:1, :]
            + x[:, 1:2] * w1[1:2, :]
            + x[:, 2:3] * w1[2:3, :])


def conv1_stats_kernel(x_ref, w1_ref, st_ref):
    """Stats-only pass: (sum, sum_sq) of z1 = x @ w1 for one point tile."""
    z1 = _layer1(x_ref[...], w1_ref[...])             # (TN, C1) f32
    # Zero-padded points contribute exactly 0 to both sums -> no masking.
    st_ref[0, 0, 0:1, :] = jnp.sum(z1, axis=0, keepdims=True)
    st_ref[0, 0, 1:2, :] = jnp.sum(z1 * z1, axis=0, keepdims=True)


def conv2_stats_kernel(x_ref, w1_ref, sc1_ref, sh1_ref, w2_ref, st_ref):
    """Recompute z1, apply folded BN1+ReLU, conv2 (MXU), emit z2 stats only."""
    z1 = _layer1(x_ref[...], w1_ref[...])
    h1 = jnp.maximum(z1 * sc1_ref[...] + sh1_ref[...], 0.0)
    z2 = jnp.dot(h1.astype(w2_ref.dtype), w2_ref[...],
                 preferred_element_type=jnp.float32)   # (TN, C2) f32
    # Padded rows add a constant row to these sums; corrected wrapper-side.
    st_ref[0, 0, 0:1, :] = jnp.sum(z2, axis=0, keepdims=True)
    st_ref[0, 0, 1:2, :] = jnp.sum(z2 * z2, axis=0, keepdims=True)


def make_conv3_stats_max_kernel(tn, n_points, needs_mask):
    """Recompute z1,z2; BN2+ReLU; conv3; emit z3 (sum, sum_sq, max, min)."""
    def kernel(x_ref, w1_ref, sc1_ref, sh1_ref, w2_ref,
               sc2_ref, sh2_ref, w3_ref, st_ref):
        z1 = _layer1(x_ref[...], w1_ref[...])
        h1 = jnp.maximum(z1 * sc1_ref[...] + sh1_ref[...], 0.0)
        z2 = jnp.dot(h1.astype(w2_ref.dtype), w2_ref[...],
                     preferred_element_type=jnp.float32)
        h2 = jnp.maximum(z2 * sc2_ref[...] + sh2_ref[...], 0.0)
        z3 = jnp.dot(h2.astype(w3_ref.dtype), w3_ref[...],
                     preferred_element_type=jnp.float32)  # (TN, K1p) f32

        st_ref[0, 0, 0:1, :] = jnp.sum(z3, axis=0, keepdims=True)
        st_ref[0, 0, 1:2, :] = jnp.sum(z3 * z3, axis=0, keepdims=True)

        def write_maxmin(z_for_max, z_for_min):
            st_ref[0, 0, 2:3, :] = jnp.max(z_for_max, axis=0, keepdims=True)
            st_ref[0, 0, 3:4, :] = jnp.min(z_for_min, axis=0, keepdims=True)

        if needs_mask:
            t = pl.program_id(1)
            last = pl.num_programs(1) - 1

            # Padded rows exist only in the last tile of each batch element,
            # so the iota/compare/select only runs there.
            @pl.when(t == last)
            def _():
                row = lax.broadcasted_iota(jnp.int32, (tn, 1), 0) + t * tn
                valid = row < n_points
                write_maxmin(jnp.where(valid, z3, -jnp.inf),
                             jnp.where(valid, z3, jnp.inf))

            @pl.when(t != last)
            def _():
                write_maxmin(z3, z3)
        else:
            write_maxmin(z3, z3)
    return kernel


# --------------------------------------------------------------------------
# Wrapper
# --------------------------------------------------------------------------
def _bn_affine(stats, gamma, beta, n_valid, pad_row=None, n_pad=0):
    """Combine per-tile (sum, sum_sq) partials, correct for padded rows,
    and fold training-mode BN into one per-channel affine (scale, shift)."""
    s = jnp.sum(stats[:, :, 0, :], axis=(0, 1))          # (C,)
    sq = jnp.sum(stats[:, :, 1, :], axis=(0, 1))
    if pad_row is not None and n_pad > 0:
        c = pad_row.reshape(-1)
        s = s - n_pad * c
        sq = sq - n_pad * (c * c)
    mean = s / n_valid
    # Biased variance (PyTorch training-mode), clamped against cancellation.
    var = jnp.maximum(sq / n_valid - mean * mean, 0.0)
    scale = gamma.reshape(-1) * lax.rsqrt(var + EPS)
    shift = beta.reshape(-1) - mean * scale
    return scale.reshape(1, -1), shift.reshape(1, -1)


def _choose_tile(n, k1p, tile_rows=None):
    """Pick TN to minimize per-batch padding while keeping the widest f32
    intermediate (z3 + its square, ~TN*K1p*8 B) comfortably inside VMEM."""
    if tile_rows is None:
        cap = (8 * 1024 * 1024) // (k1p * 8)
        cap = max(256, min(2048, cap))
    else:
        cap = max(8, tile_rows)
    cap = _round_up(cap, 8)
    nt = max(1, _cdiv(n, cap))
    tn = _round_up(_cdiv(n, nt), 8)
    nt = _cdiv(n, tn)
    return tn, nt


def pointnet_forward(x, params, tile_rows=None):
    """x: (B, N, 3) float32. Returns (B, K1) float32."""
    B, N, Cin = x.shape
    assert Cin == 3
    C1 = params["w1"].shape[1]
    C2 = params["w2"].shape[1]
    K1 = params["w3"].shape[1]
    K1p = _round_up(K1, 128)          # lane-dense work in the final layer

    TN, nt = _choose_tile(N, K1p, tile_rows)
    N_pad = TN * nt
    needs_mask = N_pad != N
    R = B * N_pad
    n_valid = B * N
    n_pad_total = B * (N_pad - N)
    grid = (B, nt)

    cp = pltpu.CompilerParams(
        dimension_semantics=("parallel", "parallel"),
        vmem_limit_bytes=VMEM_LIMIT)

    # Wrapper-side layout plumbing (free): pad + flatten to (B*N_pad, 3).
    x32 = x.astype(jnp.float32)
    if needs_mask:
        x32 = jnp.pad(x32, ((0, 0), (0, N_pad - N), (0, 0)))
    x_flat = x32.reshape(R, 3)

    # Weights: layer 1 f32 (VPU path); layers 2/3 bf16 MXU operands.
    w1 = params["w1"].astype(jnp.float32)
    w2 = params["w2"].astype(jnp.bfloat16)
    w3 = params["w3"].astype(jnp.bfloat16)
    g3, be3 = params["g3"], params["be3"]
    if K1p != K1:
        w3 = jnp.pad(w3, ((0, 0), (0, K1p - K1)))
        g3 = jnp.pad(g3, ((0, 0), (0, K1p - K1)), constant_values=1.0)
        be3 = jnp.pad(be3, ((0, 0), (0, K1p - K1)))
    # NOTE: Conv1d biases are intentionally NOT used — training-mode BN
    # subtracts the per-channel mean, cancelling them exactly.

    x_spec = pl.BlockSpec((TN, 3), lambda b, t: (b * nt + t, 0))

    def vec_spec(c):      # per-channel scale/shift broadcast to every tile
        return pl.BlockSpec((1, c), lambda b, t: (0, 0))

    def full_spec(r, c):  # whole weight matrix resident in VMEM
        return pl.BlockSpec((r, c), lambda b, t: (0, 0))

    def stats_spec(rows, c):
        return pl.BlockSpec((1, 1, rows, c), lambda b, t: (b, t, 0, 0))

    def stats_shape(rows, c):
        return jax.ShapeDtypeStruct((B, nt, rows, c), jnp.float32)

    # ---- pass 1: stats of z1 (no activation written to HBM) --------------
    st1 = pl.pallas_call(
        conv1_stats_kernel,
        grid_spec=pltpu.PrefetchScalarGridSpec(
            num_scalar_prefetch=0, grid=grid,
            in_specs=[x_spec, full_spec(3, C1)],
            out_specs=stats_spec(2, C1)),
        out_shape=stats_shape(2, C1),
        compiler_params=cp,
    )(x_flat, w1)
    sc1, sh1 = _bn_affine(st1, params["g1"], params["be1"], n_valid)

    # ---- pass 2: recompute z1, BN1+ReLU, conv2 -> stats of z2 ------------
    st2 = pl.pallas_call(
        conv2_stats_kernel,
        grid_spec=pltpu.PrefetchScalarGridSpec(
            num_scalar_prefetch=0, grid=grid,
            in_specs=[x_spec, full_spec(3, C1), vec_spec(C1), vec_spec(C1),
                      full_spec(C1, C2)],
            out_specs=stats_spec(2, C2)),
        out_shape=stats_shape(2, C2),
        compiler_params=cp,
    )(x_flat, w1, sc1, sh1, w2)
    c2 = None
    if needs_mask:
        # Padded rows (x == 0, no bias) produce a constant row in z2.
        h1_pad = jnp.maximum(sh1, 0.0)
        c2 = jnp.dot(h1_pad.astype(jnp.bfloat16), w2,
                     preferred_element_type=jnp.float32)      # (1, C2)
    sc2, sh2 = _bn_affine(st2, params["g2"], params["be2"], n_valid,
                          c2, n_pad_total)

    # ---- pass 3: recompute z1,z2; BN2+ReLU; conv3 -> stats + max/min of z3
    st3 = pl.pallas_call(
        make_conv3_stats_max_kernel(TN, N, needs_mask),
        grid_spec=pltpu.PrefetchScalarGridSpec(
            num_scalar_prefetch=0, grid=grid,
            in_specs=[x_spec, full_spec(3, C1), vec_spec(C1), vec_spec(C1),
                      full_spec(C1, C2), vec_spec(C2), vec_spec(C2),
                      full_spec(C2, K1p)],
            out_specs=stats_spec(4, K1p)),
        out_shape=stats_shape(4, K1p),
        compiler_params=cp,
    )(x_flat, w1, sc1, sh1, w2, sc2, sh2, w3)
    c3 = None
    if needs_mask:
        h2_pad = jnp.maximum(c2 * sc2 + sh2, 0.0)
        c3 = jnp.dot(h2_pad.astype(jnp.bfloat16), w3,
                     preferred_element_type=jnp.float32)      # (1, K1p)
    sc3, sh3 = _bn_affine(st3, g3, be3, n_valid, c3, n_pad_total)

    # BN3 is a per-channel monotone affine: fold BN3 + max-over-points into
    # the per-tile max/min statistics (sign-aware, exact).
    zmax = jnp.max(st3[:, :, 2, :], axis=1)                    # (B, K1p)
    zmin = jnp.min(st3[:, :, 3, :], axis=1)                    # (B, K1p)
    out = jnp.where(sc3 >= 0.0, sc3 * zmax + sh3, sc3 * zmin + sh3)
    return out[:, :K1]


# --------------------------------------------------------------------------
# Reference (pure JAX, f32, includes the conv biases) and synthetic params
# --------------------------------------------------------------------------
def pointnet_reference(x, params):
    B, N, _ = x.shape
    h = x.reshape(B * N, 3).astype(jnp.float32)

    def layer(h, w, b, g, be, relu):
        y = h @ w + b
        mean = jnp.mean(y, axis=0, keepdims=True)
        var = jnp.mean((y - mean) ** 2, axis=0, keepdims=True)
        y = (y - mean) * lax.rsqrt(var + EPS) * g + be
        return jnp.maximum(y, 0.0) if relu else y

    h = layer(h, params["w1"], params["b1"], params["g1"], params["be1"], True)
    h = layer(h, params["w2"], params["b2"], params["g2"], params["be2"], True)
    h = layer(h, params["w3"], params["b3"], params["g3"], params["be3"], False)
    K1 = h.shape[-1]
    return jnp.max(h.reshape(B, N, K1), axis=1)


def init_params(key, k1):
    """Synthetic parameters matching nn.Conv1d/nn.BatchNorm1d shapes.

    Conv1d(Cin, Cout, 1) weight (Cout, Cin, 1) is stored transposed+squeezed
    as (Cin, Cout). Biases b* are generated for the reference path only; the
    Pallas kernels drop them (exactly cancelled by training-mode BN).
    """
    dims = [(3, 64), (64, 128), (128, k1)]
    params = {}
    keys = jax.random.split(key, 3 * len(dims))
    for i, (cin, cout) in enumerate(dims, start=1):
        kw, kb, kbeta = keys[3 * (i - 1):3 * i]
        params[f"w{i}"] = (0.1 * jax.random.normal(kw, (cin, cout))).astype(jnp.float32)
        params[f"b{i}"] = (0.1 * jax.random.normal(kb, (1, cout))).astype(jnp.float32)
        params[f"g{i}"] = jnp.ones((1, cout), jnp.float32)
        params[f"be{i}"] = (0.1 * jax.random.normal(kbeta, (1, cout))).astype(jnp.float32)
    return params


if __name__ == "__main__":
    B, N, K1 = 2, 20, 32
    key = jax.random.PRNGKey(0)
    kx, kp = jax.random.split(key)
    x = jax.random.normal(kx, (B, N, 3), dtype=jnp.float32)
    params = init_params(kp, K1)

    ref = jax.block_until_ready(pointnet_reference(x, params))

    # Default tiling (one tile per batch element; padded rows masked/corrected).
    out = jax.block_until_ready(pointnet_forward(x, params))
    assert out.shape == (B, K1) and out.dtype == jnp.float32
    max_err = float(jnp.max(jnp.abs(out - ref)))
    assert max_err < 5e-2, f"max abs err {max_err}"  # bf16 MXU operands

    # Forced small tiles: exercises the multi-tile grid, the per-tile max/min
    # combine, and the last-tile padding mask.
    out2 = jax.block_until_ready(pointnet_forward(x, params, tile_rows=8))
    max_err2 = float(jnp.max(jnp.abs(out2 - ref)))
    assert max_err2 < 5e-2, f"max abs err (tiled) {max_err2}"

    print("KERNEL_OK")
</pallas_src>

<mosaic_0001>
module attributes {stable_mosaic.version = 11 : i64} {
  func.func @conv1_stats_kernel(%arg0: i32, %arg1: i32, %arg2: memref<24x3xf32, #tpu.memory_space<vmem>>, %arg3: memref<3x64xf32, #tpu.memory_space<vmem>>, %arg4: memref<1x1x2x64xf32, #tpu.memory_space<vmem>>) attributes {dimension_semantics = [#tpu.dimension_semantics<parallel>, #tpu.dimension_semantics<parallel>], iteration_bounds = array<i64: 2, 1>, scalar_prefetch = 0 : i64, scratch_operands = 0 : i64, tpu.core_type = #tpu.core_type<tc>, window_params = [{transform_indices = @transform_0, window_bounds = array<i64: 24, 3>}, {pipeline_mode = #tpu.pipeline_mode<synchronous>, transform_indices = @transform_1, window_bounds = array<i64: 3, 64>}, {transform_indices = @transform_2, window_bounds = array<i64: 1, 1, 2, 64>}]} {
    %c0 = arith.constant 0 : index
    %c0_0 = arith.constant 0 : index
    %0 = vector.load %arg2[%c0, %c0_0] : memref<24x3xf32, #tpu.memory_space<vmem>>, vector<24x3xf32>
    %c0_1 = arith.constant 0 : index
    %c0_2 = arith.constant 0 : index
    %1 = vector.load %arg3[%c0_1, %c0_2] : memref<3x64xf32, #tpu.memory_space<vmem>>, vector<3x64xf32>
    %2 = vector.extract_strided_slice %0 {offsets = [0, 0], sizes = [24, 1], strides = [1, 1]} : vector<24x3xf32> to vector<24x1xf32>
    %3 = vector.extract_strided_slice %1 {offsets = [0, 0], sizes = [1, 64], strides = [1, 1]} : vector<3x64xf32> to vector<1x64xf32>
    %4 = vector.broadcast %2 : vector<24x1xf32> to vector<24x64xf32>
    %5 = vector.broadcast %3 : vector<1x64xf32> to vector<24x64xf32>
    %6 = arith.mulf %4, %5 : vector<24x64xf32>
    %7 = vector.extract_strided_slice %0 {offsets = [0, 1], sizes = [24, 1], strides = [1, 1]} : vector<24x3xf32> to vector<24x1xf32>
    %8 = vector.extract_strided_slice %1 {offsets = [1, 0], sizes = [1, 64], strides = [1, 1]} : vector<3x64xf32> to vector<1x64xf32>
    %9 = vector.broadcast %7 : vector<24x1xf32> to vector<24x64xf32>
    %10 = vector.broadcast %8 : vector<1x64xf32> to vector<24x64xf32>
    %11 = arith.mulf %9, %10 : vector<24x64xf32>
    %12 = arith.addf %6, %11 : vector<24x64xf32>
    %13 = vector.extract_strided_slice %0 {offsets = [0, 2], sizes = [24, 1], strides = [1, 1]} : vector<24x3xf32> to vector<24x1xf32>
    %14 = vector.extract_strided_slice %1 {offsets = [2, 0], sizes = [1, 64], strides = [1, 1]} : vector<3x64xf32> to vector<1x64xf32>
    %15 = vector.broadcast %13 : vector<24x1xf32> to vector<24x64xf32>
    %16 = vector.broadcast %14 : vector<1x64xf32> to vector<24x64xf32>
    %17 = arith.mulf %15, %16 : vector<24x64xf32>
    %18 = arith.addf %12, %17 : vector<24x64xf32>
    %cst = arith.constant dense<0.000000e+00> : vector<64xf32>
    %19 = vector.multi_reduction <add>, %18, %cst [0] : vector<24x64xf32> to vector<64xf32>
    %20 = vector.shape_cast %19 : vector<64xf32> to vector<1x64xf32>
    %c0_3 = arith.constant 0 : index
    %c0_4 = arith.constant 0 : index
    %c0_5 = arith.constant 0 : index
    %c0_6 = arith.constant 0 : index
    %21 = vector.load %arg4[%c0_3, %c0_4, %c0_5, %c0_6] : memref<1x1x2x64xf32, #tpu.memory_space<vmem>>, vector<1x1x1x64xf32>
    %22 = vector.shape_cast %21 : vector<1x1x1x64xf32> to vector<1x64xf32>
    %23 = vector.shape_cast %20 : vector<1x64xf32> to vector<1x1x1x64xf32>
    tpu.vector_store %arg4[%c0_3, %c0_4, %c0_5, %c0_6], %23 {strides = array<i32>} : memref<1x1x2x64xf32, #tpu.memory_space<vmem>>, vector<1x1x1x64xf32>,
    %24 = arith.mulf %18, %18 : vector<24x64xf32>
    %cst_7 = arith.constant dense<0.000000e+00> : vector<64xf32>
    %25 = vector.multi_reduction <add>, %24, %cst_7 [0] : vector<24x64xf32> to vector<64xf32>
    %26 = vector.shape_cast %25 : vector<64xf32> to vector<1x64xf32>
    %c0_8 = arith.constant 0 : index
    %c0_9 = arith.constant 0 : index
    %c1 = arith.constant 1 : index
    %c0_10 = arith.constant 0 : index
    %27 = vector.load %arg4[%c0_8, %c0_9, %c1, %c0_10] : memref<1x1x2x64xf32, #tpu.memory_space<vmem>>, vector<1x1x1x64xf32>
    %28 = vector.shape_cast %27 : vector<1x1x1x64xf32> to vector<1x64xf32>
    %29 = vector.shape_cast %26 : vector<1x64xf32> to vector<1x1x1x64xf32>
    tpu.vector_store %arg4[%c0_8, %c0_9, %c1, %c0_10], %29 {strides = array<i32>} : memref<1x1x2x64xf32, #tpu.memory_space<vmem>>, vector<1x1x1x64xf32>,
    return
  }
  func.func @transform_0(%arg0: i32, %arg1: i32) -> (i32, i32) {
    %c1_i32 = arith.constant 1 : i32
    %0 = arith.muli %arg0, %c1_i32 : i32
    %1 = arith.addi %0, %arg1 : i32
    %c0_i32 = arith.constant 0 : i32
    %c0_i32_0 = arith.constant 0 : i32
    return %1, %c0_i32 : i32, i32
  }
  func.func @transform_1(%arg0: i32, %arg1: i32) -> (i32, i32) {
    %c0_i32 = arith.constant 0 : i32
    %c0_i32_0 = arith.constant 0 : i32
    %c0_i32_1 = arith.constant 0 : i32
    return %c0_i32, %c0_i32_0 : i32, i32
  }
  func.func @transform_2(%arg0: i32, %arg1: i32) -> (i32, i32, i32, i32) {
    %c0_i32 = arith.constant 0 : i32
    %c0_i32_0 = arith.constant 0 : i32
    %c0_i32_1 = arith.constant 0 : i32
    return %arg0, %arg1, %c0_i32, %c0_i32_0 : i32, i32, i32, i32
  }
}

</mosaic_0001>

<bundles_post_ra>
// kernel: tpu_custom_call.1
= control target key start
LH: loop header
LB: loop body
LE: loop exit
PB: predicated region body
PF: predicated region fallthrough
CT: control target
= control target key end

     0   :  { %7 = vsyncpa [#allocation3], 0  ;;  %s639_s0 = inlined_call_operand.vmem [shape: f32[48,3], index: 0, kind: input, shape index: {}]   ;;  %s640_s1 = inlined_call_operand.vmem [shape: f32[3,64], index: 1, kind: input, shape index: {}]   ;;  %s641_s2 = inlined_call_operand.hbm [shape: f32[2,1,2,64], index: 2, kind: output, shape index: {}]  }
   0x1   :  { %9 = vsyncpa [#allocation3 + $0x1], 0  ;;  %s519_s9 = smov 0   ;;  %s521_s10 = smov 0  }
   0x2   :  { %s523_s11 = smov 0   ;;  %s525_s12 = smov 0  }
   0x3   :  { %s527_s13 = smov 0   ;;  %s529_s14 = smov 0  }
   0x4 LB: > { %s347_s15 = sadd.s32 4294967295, %s498_s14   ;;  %s348_s16 = sadd.s32 4294967294, %s498_s14   ;;  %s498_s14 = sphi %s529_s14, %s15_s14   ;;  %s494_s13 = sphi %s527_s13, %s648_s13   ;;  %s490_s12 = sphi %s525_s12, %s647_s12   ;;  %s486_s11 = sphi %s523_s11, %s646_s11   ;;  %s482_s10 = sphi %s521_s10, %s645_s10   ;;  %s478_s9 = sphi %s519_s9, %s644_s9  }
   0x5   : > { %s27_s17 = sadd.s32 1, %s494_s13  ;;  %s85_s18 = sadd.s32 1, %s486_s11 }
   0x6   : > { %p29_p0 = scmp.ge.s32.totalorder %s27_s17, 2  ;;  %p95_p1 = scmp.ne.s32.totalorder %s486_s11, %s482_s10 }
   0x7   : > { %p96_p2 = scmp.eq.s32.totalorder %s347_s15, 1  ;;  %p101_p3 = scmp.ne.s32.totalorder %s482_s10, %s478_s9 }
   0x8   : > { %s650_s17 = smov (%p29_p0, %s27_s17), 0  ;;  %p102_p5 = scmp.eq.s32.totalorder %s348_s16, 1 }
   0x9   : > { %p559_p4 = por %p96_p2, %p95_p1  ;;  %s80_s20 = ssub.s32 %s494_s13, %s650_s17 }
   0xa   : > { %p351_p6 = scmp.ge.s32.totalorder %s498_s14, 1  ;;  %p83_p7 = scmp.eq.s32.totalorder %s80_s20, 0 }
   0xb   : > { %p566_p8 = por %p102_p5, %p101_p3  ;;  %p134_p9 = scmp.lt.s32.totalorder %s498_s14, 3 }
   0xc   : > { %s572_s22 = scalar_select %p83_p7, %s486_s11, %s85_s18  }
   0xd   : > { %p135_p10 = pnand %p351_p6, %p134_p9 }
   0xe   : > { %s158_s23 = smul.u32 (!%p135_p10), 3, %s490_s12  ;;  %v500_v0 = vmov (!%p135_p10), 1   ;;  %v501_v1 = vmov (!%p135_p10), 0   ;;  %v502_v5 = vmov (!%p135_p10), 2   ;;  %v184_v6 = vlaneseq (!%p135_p10)  ;;  %v168_v12 = vld [vmem:[%s640_s1] sm:$0x7] (!%p135_p10) }
   0xf   : > { %138 = sbr.rel (%p135_p10) target bundleno = 207 (0xcf), region = 28  ;;  %417 = vset.pattern.permute.xlu1 (!%p135_p10), %v500_v0  ;;  %416 = vset.pattern.permute.xlu0 (!%p135_p10), %v501_v1  ;;  %vm235_vm0 = vcmask (!%p135_p10), 523264   ;;  %s154_s30 = sand.u32 (!%p135_p10), 1, %s482_s10   ;;  %vm247_vm1 = vcmask (!%p135_p10), 516096  }
  0x10   : > { %p159_p11 = scmp.lt.s32.totalorder (!%p135_p10), %s158_s23, 5  ;;  %v185_v7 = vshrl.u32 (!%p135_p10), %v184_v6, 7  ;;  %s352_s3 = sshll.u32 (!%p135_p10), %s154_s30, 1 }
  0x11   : > { %s355_s4 = sshll.u32 (!%p135_p10), %s490_s12, 5  ;;  %s156_s5 = scalar_lea.vmem (!%p135_p10), [#allocation2], %s352_s3 }
  0x12   : > { %v205_v10 = vsub.s32 (!%p135_p10), 1, %v185_v7  ;;  %v186_v11 = vsub.s32 (!%p135_p10), 0, %v185_v7  ;;  %v227_v15 = vsub.s32 (!%p135_p10), 2, %v185_v7  ;;  %s279_s6 = sshll.u32 (!%p135_p10), %s156_s5, 4  ;;  %s592_s15 = scalar_lea.hbm (!%p135_p10), %s641_s2, %s355_s4  ;;  %s594_s6 = int_to_ptr.vmem [resolvable:$true] %s279_s6 }
  0x13   : > { %s265_s16 = scalar_lea.sflag (!%p135_p10), [#allocation3], %s154_s30  ;;  %s420_s18 = scalar_lea.vmem (!%p135_p10), %s594_s6, 32 }
  0x14   : > { %v206_v16 = vrot.slane (!%p135_p10), %v168_v12, %v205_v10  ;;  %v187_v17 = vrot.slane (!%p135_p10), %v168_v12, %v186_v11  ;;  %v228_v20 = vrot.slane (!%p135_p10), %v168_v12, %v227_v15  ;;  %p421_p12 = scmp.ne.s32.totalorder (!%p135_p10), %s594_s6, %s420_s18  ;;  %s503_s12 = smov (!%p135_p10), [#allocation2]  }
  0x15   : > { %s424_s20 = sshll.u32 (!%p135_p10), %s503_s12, 4  ;;  %s425_s20 = int_to_ptr.vmem [resolvable:$false] %s424_s20 }
  0x16   : > { %s652_s23 = smov (!%p159_p11, %s158_s23), 5  ;;  %p422_p13 = pnand %p421_p12, %p559_p4 }
  0x17   : > { %s353_s24 = sshll.u32 %s652_s23, 3  ;;  %s426_s23 = scalar_lea.vmem %s425_s20, 64 }
  0x18   : > { %s162_s27 = scalar_lea.vmem %s639_s0, %s353_s24  ;;  %p423_p0 = pneg %p422_p13 }
  0x19   : > { %v165_v2 = vld [vmem:[%s162_s27] sm:$0xff]  ;;  %v166_v3 = vld [vmem:[%s162_s27 + $0x8] sm:$0xff]  ;;  %v167_v4 = vld [vmem:[%s162_s27 + $0x10] sm:$0xff]  ;;  %p427_p1 = scmp.lt.s32.totalorder %s594_s6, %s425_s20  ;;  %p428_p2 = scmp.lt.s32.totalorder %s426_s23, %s420_s18 }
  0x1a   : > { %192 = vperm.xlu1 %417, %v165_v2   ;;  %171 = vperm.xlu0 %416, %v165_v2  }
  0x1b   : > { %p429_p3 = por %p428_p2, %p427_p1 }
  0x1d   : > { %p430_p5 = pnand %p429_p3, %p423_p0 }
  0x1e   : > { %196 = vperm.xlu1 %417, %v166_v3   ;;  %176 = vperm.xlu0 %416, %v166_v3  }
  0x22   : > { %200 = vperm.xlu1 %417, %v167_v4   ;;  %181 = vperm.xlu0 %416, %v167_v4  }
  0x26   : > { %419 = vset.pattern.permute.xlu1 %v502_v5  ;;  %418 = vset.pattern.permute.xlu0 %v502_v5 }
  0x27   : > { %218 = vperm.xlu1 %419, %v166_v3   ;;  %214 = vperm.xlu0 %418, %v165_v2  }
  0x2b   : > { %222 = vperm.xlu1 %419, %v167_v4  }
  0x99   : > { %v193_v8 = vpop.permute.xlu1 %192  ;;  %v172_v9 = vpop.permute.xlu0 %171 }
  0x9a   : > { %v207_v21 = vmul.f32 %v206_v16, %v193_v8  ;;  %v188_v22 = vmul.f32 %v187_v17, %v172_v9 }
  0x9c   : > { %v210_v27 = vadd.f32 %v207_v21, %v188_v22 }
  0x9d   : > { %v197_v13 = vpop.permute.xlu1 %196  ;;  %v177_v14 = vpop.permute.xlu0 %176 }
  0x9e   : > { %v208_v23 = vmul.f32 %v206_v16, %v197_v13  ;;  %v189_v24 = vmul.f32 %v187_v17, %v177_v14 }
  0xa0   : > { %v211_v28 = vadd.f32 %v208_v23, %v189_v24 }
  0xa1   : > { %v201_v18 = vpop.permute.xlu1 %200  ;;  %v182_v19 = vpop.permute.xlu0 %181 }
  0xa2   : > { %v209_v31 = vmul.f32 %v206_v16, %v201_v18  ;;  %v190_v32 = vmul.f32 %v187_v17, %v182_v19 }
  0xa4   : > { %v212_v38 = vadd.f32 %v209_v31, %v190_v32 }
  0xa6   : > { %v219_v25 = vpop.permute.xlu1 %218  ;;  %v215_v26 = vpop.permute.xlu0 %214 }
  0xa7   : > { %v230_v29 = vmul.f32 %v228_v20, %v219_v25  ;;  %v229_v30 = vmul.f32 %v228_v20, %v215_v26 }
  0xa9   : > { %v233_v33 = vadd.f32 %v230_v29, %v211_v28  ;;  %v232_v34 = vadd.f32 %v229_v30, %v210_v27 }
  0xaa   : > { %v223_v35 = vpop.permute.xlu1 %222 }
  0xab   : > { %v250_v36 = vmul.f32 %v233_v33, %v233_v33  ;;  %v249_v37 = vmul.f32 %v232_v34, %v232_v34  ;;  %v237_v39 = vsel %vm235_vm0, %v233_v33, 0.0  ;;  %v236_v40 = vsel %vm235_vm0, %v232_v34, 0.0 }
  0xac   : > { %v231_v41 = vmul.f32 %v228_v20, %v223_v35  ;;  %v238_v45 = vadd.f32 %v237_v39, %v236_v40 }
  0xad   : > { %v253_v42 = vsel %vm235_vm0, %v250_v36, 0.0  ;;  %v252_v43 = vsel %vm235_vm0, %v249_v37, 0.0 }
  0xae   : > { %v234_v44 = vadd.f32 %v231_v41, %v212_v38  ;;  %v254_v48 = vadd.f32 %v253_v42, %v252_v43 }
  0xb0   : > { %v239_v46 = vsel %vm235_vm0, %v234_v44, 0.0  ;;  %v251_v47 = vmul.f32 %v234_v44, %v234_v44 }
  0xb1   : > { %v240_v49 = vadd.f32 %v239_v46, %v238_v45 }
  0xb2   : > { %v255_v50 = vsel %vm235_vm0, %v251_v47, 0.0 }
  0xb3   : > { %v241_v51 = vrot.slane %v240_v49, 4  ;;  %v256_v52 = vadd.f32 %v255_v50, %v254_v48 }
  0xb5   : > { %v242_v53 = vadd.f32 %v241_v51, %v240_v49  ;;  %v257_v54 = vrot.slane %v256_v52, 4 }
  0xb7   : > { %v243_v55 = vrot.slane %v242_v53, 2  ;;  %v258_v56 = vadd.f32 %v257_v54, %v256_v52 }
  0xb9   : > { %v244_v57 = vadd.f32 %v243_v55, %v242_v53  ;;  %v259_v58 = vrot.slane %v258_v56, 2 }
  0xbb   : > { %v245_v59 = vrot.slane %v244_v57, 1  ;;  %v260_v60 = vadd.f32 %v259_v58, %v258_v56 }
  0xbd   : > { %v246_v61 = vadd.f32 %v245_v59, %v244_v57  ;;  %v261_v62 = vrot.slane %v260_v60, 1 }
  0xbf   : > { %248 = vst.msk [vmem:[%s156_s5] sm:$0x1] %vm247_vm1, %v246_v61  ;;  %v262_v63 = vadd.f32 %v261_v62, %v260_v60 }
  0xc1   : > { %263 = vst.msk [vmem:[%s156_s5 + $0x1] sm:$0x1] %vm247_vm1, %v262_v63 }
  0xc2   : > { %433 = shalt.err (!%p430_p5)
}
  0xc3   : > { %s434_s24 = scalar_lea.hbm %s592_s15, 32  ;;  %s438_s27 = scalar_lea.hbm %s641_s2, 64 }
  0xc4   : > { %p435_p6 = scmp.ne.s32.totalorder %s592_s15, %s434_s24  ;;  %p439_p10 = scmp.lt.u32.totalorder %s592_s15, %s641_s2 }
  0xc5   : > { %p440_p11 = scmp.lt.u32.totalorder %s438_s27, %s434_s24  ;;  %p442_p13 = scmp.lt.u32.totalorder %s434_s24, %s592_s15 }
  0xc6   : > { %p436_p7 = pnand %p435_p6, %p559_p4 }
  0xc7   : > { %p441_p12 = por %p440_p11, %p439_p10 }
  0xc8   : > { %p437_p9 = pneg %p436_p7 }
  0xc9   : > { %p443_p0 = por %p442_p13, %p441_p12 }
  0xcb   : > { %p444_p1 = pnand %p443_p0, %p437_p9 }
  0xcd   : > { %447 = shalt.err (!%p444_p1)
}
  0xce   : > { %358 = dma.vmem_to_hbm [thread:$0]  (%p559_p4), %s594_s6, 32, %s592_s15, %s265_s16  }
  0xcf PF: > { %p364_p2 = scmp.ge.s32.totalorder %s498_s14, 2  ;;  %s291_s30 = sand.u32 1, %s478_s9  }
  0xd0   : > { %s292_s3 = scalar_lea.sflag [#allocation3], %s291_s30 }
  0xd1   : > { %p361_p3 = pnand %p364_p2, %p566_p8 }
  0xd3   : > { %473 = dma.done.wait (!%p361_p3), %s292_s3, 32  }
  0xd4   : > { %475 = vsyncadd (!%p361_p3), %s292_s3, 4294967264  ;;  %s15_s14 = sadd.s32 1, %s498_s14   ;;  %s644_s9 = smov %s482_s10 }
  0xd5   : > { %p12_p5 = scmp.ge.s32.totalorder %s15_s14, 4   ;;  %s645_s10 = smov %s486_s11 }
  0xd6   : > { %s646_s11 = smov %s572_s22  ;;  %s647_s12 = smov %s494_s13 }
  0xd7   : > { %s648_s13 = smov %s650_s17  ;;  %14 = sbr.rel (!%p12_p5) target bundleno = 4 (0x4), region = 63 }
  0xde   :  { %297 = vsyncpa [#allocation3], 1 }
  0xdf   :  { %299 = vsyncpa [#allocation3 + $0x1], 1 }

</bundles_post_ra>
